<compile_context>
chip_gen: v6e
topology: v6e:2x2x1
jax: 0.10.0
libtpu: 0.0.40
codegen_flags: <defaults>
</compile_context>

<pallas_src>
import functools

import jax
import jax.numpy as jnp
from jax.experimental import pallas as pl
from jax.experimental.pallas import tpu as pltpu


def _make_kernel(k, s, CB, oH, oW):
    """Fused depthwise window-reduction kernel; all shape params are static."""
    kk, s2 = k * k, s * s

    def kernel(x_ref, w1_ref, w2_ref, b_ref, o_ref):
        # x_ref : (1, CB*s*s, Hq, Wq)  space-to-depth padded input tile (VMEM)
        # w1_ref/w2_ref : (C*k*k,)     per-(channel, window-offset) weights (SMEM)
        # b_ref : (2*C,)               per-output-channel biases            (SMEM)
        # o_ref : (1, 2*CB, oH, oW)    interleaved [res1_c, res2_c, ...] output
        c0 = pl.program_id(1) * CB                 # first global channel of block
        outs = []
        for c in range(CB):                        # static unroll: CB, k are small
            cg = c0 + c
            acc1 = jnp.zeros((oH, oW), jnp.float32)
            acc2 = jnp.zeros((oH, oW), jnp.float32)
            for i in range(k):
                for j in range(k):
                    e = i * k + j
                    g = (i % s) * s + (j % s)      # space-to-depth group
                    qi, qj = i // s, j // s
                    v = x_ref[0, c * s2 + g,
                              qi:qi + oH, qj:qj + oW].astype(jnp.float32)
                    acc1 = acc1 + v * w1_ref[cg * kk + e]   # SMEM scalar weights
                    acc2 = acc2 + v * w2_ref[cg * kk + e]
            outs.append(acc1 + b_ref[2 * cg])               # final channel 2c
            outs.append(acc2 + b_ref[2 * cg + 1])           # final channel 2c+1
        res = jnp.stack(outs, axis=0).astype(o_ref.dtype)   # (2*CB, oH, oW)
        o_ref[...] = res[None]                              # one store per block

    return kernel


def _choose_cb(B, C, s2, Hq, Wq, oH, oW, itemsize,
               vmem_block_budget=12 * 1024 * 1024, target_steps=8):
    """Channels per grid step: keep double-buffered in+out blocks well under the
    budget (safe on v7x's 64 MiB VMEM), keep accumulators register-resident
    (CB <= 4 at CIFAR-scale planes), and when free keep >= ~target_steps grid
    steps so both v7x TensorCores get balanced work."""
    per_c = 2 * (s2 * Hq * Wq + 2 * oH * oW) * itemsize   # 2x = double buffering
    cap = max(1, vmem_block_budget // per_c)
    want_blocks = max(1, -(-target_steps // B))           # ceil(target_steps / B)
    cb = max(1, min(C, cap, 4, max(1, C // want_blocks)))
    while C % cb:                                         # keep the grid exact
        cb -= 1
    return cb


@functools.partial(jax.jit, static_argnames=("kernel_size", "padding", "stride"))
def my_conv_forward(x, weight1, weight2, bias, *, kernel_size, padding, stride):
    """x: (B, C, H, W); weight1/weight2: (1, 1, C, k*k); bias: (1, 2C, 1, 1).
    Returns (B, 2C, oH, oW), matching my_conv.forward (groups is unused there)."""
    B, C, H, W = x.shape
    k, p, s = kernel_size, padding, stride
    kk, s2 = k * k, s * s
    Hp, Wp = H + 2 * p, W + 2 * p
    oH = (Hp - k) // s + 1
    oW = (Wp - k) // s + 1
    Hq, Wq = -(-Hp // s), -(-Wp // s)

    # ---- space-to-depth: same byte count as the padded input (no k*k blow-up).
    # xr[b, c*s^2 + a*s + r, y, z] == xp[b, c, y*s + a, z*s + r]
    xp = jnp.pad(x, ((0, 0), (0, 0),
                     (p, p + Hq * s - Hp), (p, p + Wq * s - Wp)))
    xr = xp.reshape(B, C, Hq, s, Wq, s).transpose(0, 1, 3, 5, 2, 4)
    xr = xr.reshape(B, C * s2, Hq, Wq)

    # Flat parameter tables for SMEM scalar reads.
    w1 = weight1.reshape(C * kk).astype(jnp.float32)
    w2 = weight2.reshape(C * kk).astype(jnp.float32)
    b = bias.reshape(2 * C).astype(jnp.float32)

    CB = _choose_cb(B, C, s2, Hq, Wq, oH, oW, x.dtype.itemsize)
    grid = (B, C // CB)

    in_block = CB * s2 * Hq * Wq * x.dtype.itemsize
    out_block = 2 * CB * oH * oW * x.dtype.itemsize
    vmem_limit = int(min(48 * 1024 * 1024,
                         max(32 * 1024 * 1024, 4 * (in_block + out_block))))

    kernel = _make_kernel(k, s, CB, oH, oW)
    out = pl.pallas_call(
        kernel,
        out_shape=jax.ShapeDtypeStruct((B, 2 * C, oH, oW), x.dtype),
        grid_spec=pltpu.PrefetchScalarGridSpec(
            num_scalar_prefetch=0,
            grid=grid,
            in_specs=[
                pl.BlockSpec((1, CB * s2, Hq, Wq), lambda bb, cb: (bb, cb, 0, 0)),
                pl.BlockSpec(memory_space=pltpu.MemorySpace.SMEM),
                pl.BlockSpec(memory_space=pltpu.MemorySpace.SMEM),
                pl.BlockSpec(memory_space=pltpu.MemorySpace.SMEM),
            ],
            out_specs=pl.BlockSpec((1, 2 * CB, oH, oW), lambda bb, cb: (bb, cb, 0, 0)),
        ),
        compiler_params=pltpu.CompilerParams(
            dimension_semantics=("parallel", "parallel"),
            vmem_limit_bytes=vmem_limit,
        ),
    )(xr, w1, w2, b)
    # TODO(synk): for much larger spatial sizes than CIFAR, additionally tile
    # output rows (with a k-1 row halo) so per-channel accumulators stay in vregs.
    return out


def _reference_forward(x, weight1, weight2, bias, k, p, s):
    """Literal JAX transcription of my_conv.forward (torch semantics)."""
    B, C, H, W = x.shape
    xp = jnp.pad(x, ((0, 0), (0, 0), (p, p), (p, p)))
    oH = (H + 2 * p - k) // s + 1
    oW = (W + 2 * p - k) // s + 1
    cols = []
    for c in range(C):                                       # Unfold: channel-major,
        for i in range(k):                                   # kernel offsets row-major,
            for j in range(k):                               # windows row-major
                cols.append(
                    xp[:, c, i:i + (oH - 1) * s + 1:s,
                       j:j + (oW - 1) * s + 1:s].reshape(B, oH * oW))
    unf = jnp.stack(cols, axis=1)                            # (B, C*kk, L)
    pat = unf.reshape(B, C, k * k, oH * oW).transpose(0, 3, 1, 2)   # (B, L, C, kk)
    w1 = weight1.reshape(C, k * k)
    w2 = weight2.reshape(C, k * k)
    res1 = jnp.sum(pat * w1, axis=3)
    res2 = jnp.sum(pat * w2, axis=3)
    cat = jnp.concatenate([res1, res2], axis=2)              # (B, L, 2C)
    out = cat.transpose(0, 2, 1).reshape(B, 2 * C, oH, oW)
    order = []
    for i in range(C):
        order.append(i)
        order.append(i + C)
    out = out[:, jnp.array(order), :, :]
    return out + bias


if __name__ == "__main__":
    # Small shapes consistent with the module: in_feature=4, out_feature=8,
    # kernel=3, padding=1, stride=1, 16x16 images, batch 2.
    B, C, H, W = 2, 4, 16, 16
    kernel_size, padding, stride = 3, 1, 1
    out_feature = 2 * C

    key = jax.random.PRNGKey(0)
    kx, k1, k2, kb = jax.random.split(key, 4)
    x = jax.random.normal(kx, (B, C, H, W), dtype=jnp.float32)
    # Parameter shapes from my_conv.__init__ (random values instead of the
    # constant init so the correctness check is meaningful).
    weight1 = jax.random.normal(k1, (1, 1, C, kernel_size * kernel_size),
                                dtype=jnp.float32)
    weight2 = jax.random.normal(k2, (1, 1, C, kernel_size * kernel_size),
                                dtype=jnp.float32)
    bias = jax.random.normal(kb, (1, out_feature, 1, 1), dtype=jnp.float32)

    out = my_conv_forward(x, weight1, weight2, bias,
                          kernel_size=kernel_size, padding=padding, stride=stride)
    out = jax.block_until_ready(out)

    ref = _reference_forward(x, weight1, weight2, bias, kernel_size, padding, stride)
    assert out.shape == ref.shape == (B, out_feature, H, W)
    assert jnp.allclose(out, ref, atol=1e-5, rtol=1e-5)

    print("KERNEL_OK")
</pallas_src>

<mosaic_0001>
module attributes {stable_mosaic.version = 11 : i64} {
  func.func @kernel(%arg0: i32, %arg1: i32, %arg2: memref<1x1x18x18xf32, #tpu.memory_space<vmem>>, %arg3: memref<36xf32, #tpu.memory_space<smem>>, %arg4: memref<36xf32, #tpu.memory_space<smem>>, %arg5: memref<8xf32, #tpu.memory_space<smem>>, %arg6: memref<1x2x16x16xf32, #tpu.memory_space<vmem>>) attributes {dimension_semantics = [#tpu.dimension_semantics<parallel>, #tpu.dimension_semantics<parallel>], iteration_bounds = array<i64: 2, 4>, scalar_prefetch = 0 : i64, scratch_operands = 0 : i64, tpu.core_type = #tpu.core_type<tc>, window_params = [{transform_indices = @transform_0, window_bounds = array<i64: 1, 1, 18, 18>}, {transform_indices = @transform_1, window_bounds = array<i64: 36>}, {transform_indices = @transform_2, window_bounds = array<i64: 36>}, {transform_indices = @transform_3, window_bounds = array<i64: 8>}, {transform_indices = @transform_4, window_bounds = array<i64: 1, 2, 16, 16>}]} {
    %c1_i32 = arith.constant 1 : i32
    %0 = arith.muli %arg1, %c1_i32 : i32
    %c0_i32 = arith.constant 0 : i32
    %1 = arith.addi %0, %c0_i32 : i32
    %cst = arith.constant 0.000000e+00 : f32
    %2 = vector.broadcast %cst : f32 to vector<16x16xf32>
    %cst_0 = arith.constant 0.000000e+00 : f32
    %3 = vector.broadcast %cst_0 : f32 to vector<16x16xf32>
    %c0 = arith.constant 0 : index
    %c0_1 = arith.constant 0 : index
    %c0_2 = arith.constant 0 : index
    %c0_3 = arith.constant 0 : index
    %4 = vector.load %arg2[%c0, %c0_1, %c0_2, %c0_3] : memref<1x1x18x18xf32, #tpu.memory_space<vmem>>, vector<1x1x16x16xf32>
    %5 = vector.shape_cast %4 : vector<1x1x16x16xf32> to vector<16x16xf32>
    %c9_i32 = arith.constant 9 : i32
    %6 = arith.muli %1, %c9_i32 : i32
    %c0_i32_4 = arith.constant 0 : i32
    %7 = arith.addi %6, %c0_i32_4 : i32
    %8 = arith.index_cast %7 : i32 to index
    %9 = memref.load %arg3[%8] : memref<36xf32, #tpu.memory_space<smem>>
    %10 = vector.broadcast %9 : f32 to vector<16x16xf32>
    %11 = arith.mulf %5, %10 : vector<16x16xf32>
    %12 = arith.addf %2, %11 : vector<16x16xf32>
    %c9_i32_5 = arith.constant 9 : i32
    %13 = arith.muli %1, %c9_i32_5 : i32
    %c0_i32_6 = arith.constant 0 : i32
    %14 = arith.addi %13, %c0_i32_6 : i32
    %15 = arith.index_cast %14 : i32 to index
    %16 = memref.load %arg4[%15] : memref<36xf32, #tpu.memory_space<smem>>
    %17 = vector.broadcast %16 : f32 to vector<16x16xf32>
    %18 = arith.mulf %5, %17 : vector<16x16xf32>
    %19 = arith.addf %3, %18 : vector<16x16xf32>
    %c0_7 = arith.constant 0 : index
    %c0_8 = arith.constant 0 : index
    %c0_9 = arith.constant 0 : index
    %c1 = arith.constant 1 : index
    %20 = vector.load %arg2[%c0_7, %c0_8, %c0_9, %c1] : memref<1x1x18x18xf32, #tpu.memory_space<vmem>>, vector<1x1x16x16xf32>
    %21 = vector.shape_cast %20 : vector<1x1x16x16xf32> to vector<16x16xf32>
    %c9_i32_10 = arith.constant 9 : i32
    %22 = arith.muli %1, %c9_i32_10 : i32
    %c1_i32_11 = arith.constant 1 : i32
    %23 = arith.addi %22, %c1_i32_11 : i32
    %24 = arith.index_cast %23 : i32 to index
    %25 = memref.load %arg3[%24] : memref<36xf32, #tpu.memory_space<smem>>
    %26 = vector.broadcast %25 : f32 to vector<16x16xf32>
    %27 = arith.mulf %21, %26 : vector<16x16xf32>
    %28 = arith.addf %12, %27 : vector<16x16xf32>
    %c9_i32_12 = arith.constant 9 : i32
    %29 = arith.muli %1, %c9_i32_12 : i32
    %c1_i32_13 = arith.constant 1 : i32
    %30 = arith.addi %29, %c1_i32_13 : i32
    %31 = arith.index_cast %30 : i32 to index
    %32 = memref.load %arg4[%31] : memref<36xf32, #tpu.memory_space<smem>>
    %33 = vector.broadcast %32 : f32 to vector<16x16xf32>
    %34 = arith.mulf %21, %33 : vector<16x16xf32>
    %35 = arith.addf %19, %34 : vector<16x16xf32>
    %c0_14 = arith.constant 0 : index
    %c0_15 = arith.constant 0 : index
    %c0_16 = arith.constant 0 : index
    %c2 = arith.constant 2 : index
    %36 = vector.load %arg2[%c0_14, %c0_15, %c0_16, %c2] : memref<1x1x18x18xf32, #tpu.memory_space<vmem>>, vector<1x1x16x16xf32>
    %37 = vector.shape_cast %36 : vector<1x1x16x16xf32> to vector<16x16xf32>
    %c9_i32_17 = arith.constant 9 : i32
    %38 = arith.muli %1, %c9_i32_17 : i32
    %c2_i32 = arith.constant 2 : i32
    %39 = arith.addi %38, %c2_i32 : i32
    %40 = arith.index_cast %39 : i32 to index
    %41 = memref.load %arg3[%40] : memref<36xf32, #tpu.memory_space<smem>>
    %42 = vector.broadcast %41 : f32 to vector<16x16xf32>
    %43 = arith.mulf %37, %42 : vector<16x16xf32>
    %44 = arith.addf %28, %43 : vector<16x16xf32>
    %c9_i32_18 = arith.constant 9 : i32
    %45 = arith.muli %1, %c9_i32_18 : i32
    %c2_i32_19 = arith.constant 2 : i32
    %46 = arith.addi %45, %c2_i32_19 : i32
    %47 = arith.index_cast %46 : i32 to index
    %48 = memref.load %arg4[%47] : memref<36xf32, #tpu.memory_space<smem>>
    %49 = vector.broadcast %48 : f32 to vector<16x16xf32>
    %50 = arith.mulf %37, %49 : vector<16x16xf32>
    %51 = arith.addf %35, %50 : vector<16x16xf32>
    %c0_20 = arith.constant 0 : index
    %c0_21 = arith.constant 0 : index
    %c1_22 = arith.constant 1 : index
    %c0_23 = arith.constant 0 : index
    %52 = vector.load %arg2[%c0_20, %c0_21, %c1_22, %c0_23] : memref<1x1x18x18xf32, #tpu.memory_space<vmem>>, vector<1x1x16x16xf32>
    %53 = vector.shape_cast %52 : vector<1x1x16x16xf32> to vector<16x16xf32>
    %c9_i32_24 = arith.constant 9 : i32
    %54 = arith.muli %1, %c9_i32_24 : i32
    %c3_i32 = arith.constant 3 : i32
    %55 = arith.addi %54, %c3_i32 : i32
    %56 = arith.index_cast %55 : i32 to index
    %57 = memref.load %arg3[%56] : memref<36xf32, #tpu.memory_space<smem>>
    %58 = vector.broadcast %57 : f32 to vector<16x16xf32>
    %59 = arith.mulf %53, %58 : vector<16x16xf32>
    %60 = arith.addf %44, %59 : vector<16x16xf32>
    %c9_i32_25 = arith.constant 9 : i32
    %61 = arith.muli %1, %c9_i32_25 : i32
    %c3_i32_26 = arith.constant 3 : i32
    %62 = arith.addi %61, %c3_i32_26 : i32
    %63 = arith.index_cast %62 : i32 to index
    %64 = memref.load %arg4[%63] : memref<36xf32, #tpu.memory_space<smem>>
    %65 = vector.broadcast %64 : f32 to vector<16x16xf32>
    %66 = arith.mulf %53, %65 : vector<16x16xf32>
    %67 = arith.addf %51, %66 : vector<16x16xf32>
    %c0_27 = arith.constant 0 : index
    %c0_28 = arith.constant 0 : index
    %c1_29 = arith.constant 1 : index
    %c1_30 = arith.constant 1 : index
    %68 = vector.load %arg2[%c0_27, %c0_28, %c1_29, %c1_30] : memref<1x1x18x18xf32, #tpu.memory_space<vmem>>, vector<1x1x16x16xf32>
    %69 = vector.shape_cast %68 : vector<1x1x16x16xf32> to vector<16x16xf32>
    %c9_i32_31 = arith.constant 9 : i32
    %70 = arith.muli %1, %c9_i32_31 : i32
    %c4_i32 = arith.constant 4 : i32
    %71 = arith.addi %70, %c4_i32 : i32
    %72 = arith.index_cast %71 : i32 to index
    %73 = memref.load %arg3[%72] : memref<36xf32, #tpu.memory_space<smem>>
    %74 = vector.broadcast %73 : f32 to vector<16x16xf32>
    %75 = arith.mulf %69, %74 : vector<16x16xf32>
    %76 = arith.addf %60, %75 : vector<16x16xf32>
    %c9_i32_32 = arith.constant 9 : i32
    %77 = arith.muli %1, %c9_i32_32 : i32
    %c4_i32_33 = arith.constant 4 : i32
    %78 = arith.addi %77, %c4_i32_33 : i32
    %79 = arith.index_cast %78 : i32 to index
    %80 = memref.load %arg4[%79] : memref<36xf32, #tpu.memory_space<smem>>
    %81 = vector.broadcast %80 : f32 to vector<16x16xf32>
    %82 = arith.mulf %69, %81 : vector<16x16xf32>
    %83 = arith.addf %67, %82 : vector<16x16xf32>
    %c0_34 = arith.constant 0 : index
    %c0_35 = arith.constant 0 : index
    %c1_36 = arith.constant 1 : index
    %c2_37 = arith.constant 2 : index
    %84 = vector.load %arg2[%c0_34, %c0_35, %c1_36, %c2_37] : memref<1x1x18x18xf32, #tpu.memory_space<vmem>>, vector<1x1x16x16xf32>
    %85 = vector.shape_cast %84 : vector<1x1x16x16xf32> to vector<16x16xf32>
    %c9_i32_38 = arith.constant 9 : i32
    %86 = arith.muli %1, %c9_i32_38 : i32
    %c5_i32 = arith.constant 5 : i32
    %87 = arith.addi %86, %c5_i32 : i32
    %88 = arith.index_cast %87 : i32 to index
    %89 = memref.load %arg3[%88] : memref<36xf32, #tpu.memory_space<smem>>
    %90 = vector.broadcast %89 : f32 to vector<16x16xf32>
    %91 = arith.mulf %85, %90 : vector<16x16xf32>
    %92 = arith.addf %76, %91 : vector<16x16xf32>
    %c9_i32_39 = arith.constant 9 : i32
    %93 = arith.muli %1, %c9_i32_39 : i32
    %c5_i32_40 = arith.constant 5 : i32
    %94 = arith.addi %93, %c5_i32_40 : i32
    %95 = arith.index_cast %94 : i32 to index
    %96 = memref.load %arg4[%95] : memref<36xf32, #tpu.memory_space<smem>>
    %97 = vector.broadcast %96 : f32 to vector<16x16xf32>
    %98 = arith.mulf %85, %97 : vector<16x16xf32>
    %99 = arith.addf %83, %98 : vector<16x16xf32>
    %c0_41 = arith.constant 0 : index
    %c0_42 = arith.constant 0 : index
    %c2_43 = arith.constant 2 : index
    %c0_44 = arith.constant 0 : index
    %100 = vector.load %arg2[%c0_41, %c0_42, %c2_43, %c0_44] : memref<1x1x18x18xf32, #tpu.memory_space<vmem>>, vector<1x1x16x16xf32>
    %101 = vector.shape_cast %100 : vector<1x1x16x16xf32> to vector<16x16xf32>
    %c9_i32_45 = arith.constant 9 : i32
    %102 = arith.muli %1, %c9_i32_45 : i32
    %c6_i32 = arith.constant 6 : i32
    %103 = arith.addi %102, %c6_i32 : i32
    %104 = arith.index_cast %103 : i32 to index
    %105 = memref.load %arg3[%104] : memref<36xf32, #tpu.memory_space<smem>>
    %106 = vector.broadcast %105 : f32 to vector<16x16xf32>
    %107 = arith.mulf %101, %106 : vector<16x16xf32>
    %108 = arith.addf %92, %107 : vector<16x16xf32>
    %c9_i32_46 = arith.constant 9 : i32
    %109 = arith.muli %1, %c9_i32_46 : i32
    %c6_i32_47 = arith.constant 6 : i32
    %110 = arith.addi %109, %c6_i32_47 : i32
    %111 = arith.index_cast %110 : i32 to index
    %112 = memref.load %arg4[%111] : memref<36xf32, #tpu.memory_space<smem>>
    %113 = vector.broadcast %112 : f32 to vector<16x16xf32>
    %114 = arith.mulf %101, %113 : vector<16x16xf32>
    %115 = arith.addf %99, %114 : vector<16x16xf32>
    %c0_48 = arith.constant 0 : index
    %c0_49 = arith.constant 0 : index
    %c2_50 = arith.constant 2 : index
    %c1_51 = arith.constant 1 : index
    %116 = vector.load %arg2[%c0_48, %c0_49, %c2_50, %c1_51] : memref<1x1x18x18xf32, #tpu.memory_space<vmem>>, vector<1x1x16x16xf32>
    %117 = vector.shape_cast %116 : vector<1x1x16x16xf32> to vector<16x16xf32>
    %c9_i32_52 = arith.constant 9 : i32
    %118 = arith.muli %1, %c9_i32_52 : i32
    %c7_i32 = arith.constant 7 : i32
    %119 = arith.addi %118, %c7_i32 : i32
    %120 = arith.index_cast %119 : i32 to index
    %121 = memref.load %arg3[%120] : memref<36xf32, #tpu.memory_space<smem>>
    %122 = vector.broadcast %121 : f32 to vector<16x16xf32>
    %123 = arith.mulf %117, %122 : vector<16x16xf32>
    %124 = arith.addf %108, %123 : vector<16x16xf32>
    %c9_i32_53 = arith.constant 9 : i32
    %125 = arith.muli %1, %c9_i32_53 : i32
    %c7_i32_54 = arith.constant 7 : i32
    %126 = arith.addi %125, %c7_i32_54 : i32
    %127 = arith.index_cast %126 : i32 to index
    %128 = memref.load %arg4[%127] : memref<36xf32, #tpu.memory_space<smem>>
    %129 = vector.broadcast %128 : f32 to vector<16x16xf32>
    %130 = arith.mulf %117, %129 : vector<16x16xf32>
    %131 = arith.addf %115, %130 : vector<16x16xf32>
    %c0_55 = arith.constant 0 : index
    %c0_56 = arith.constant 0 : index
    %c2_57 = arith.constant 2 : index
    %c2_58 = arith.constant 2 : index
    %132 = vector.load %arg2[%c0_55, %c0_56, %c2_57, %c2_58] : memref<1x1x18x18xf32, #tpu.memory_space<vmem>>, vector<1x1x16x16xf32>
    %133 = vector.shape_cast %132 : vector<1x1x16x16xf32> to vector<16x16xf32>
    %c9_i32_59 = arith.constant 9 : i32
    %134 = arith.muli %1, %c9_i32_59 : i32
    %c8_i32 = arith.constant 8 : i32
    %135 = arith.addi %134, %c8_i32 : i32
    %136 = arith.index_cast %135 : i32 to index
    %137 = memref.load %arg3[%136] : memref<36xf32, #tpu.memory_space<smem>>
    %138 = vector.broadcast %137 : f32 to vector<16x16xf32>
    %139 = arith.mulf %133, %138 : vector<16x16xf32>
    %140 = arith.addf %124, %139 : vector<16x16xf32>
    %c9_i32_60 = arith.constant 9 : i32
    %141 = arith.muli %1, %c9_i32_60 : i32
    %c8_i32_61 = arith.constant 8 : i32
    %142 = arith.addi %141, %c8_i32_61 : i32
    %143 = arith.index_cast %142 : i32 to index
    %144 = memref.load %arg4[%143] : memref<36xf32, #tpu.memory_space<smem>>
    %145 = vector.broadcast %144 : f32 to vector<16x16xf32>
    %146 = arith.mulf %133, %145 : vector<16x16xf32>
    %147 = arith.addf %131, %146 : vector<16x16xf32>
    %c2_i32_62 = arith.constant 2 : i32
    %148 = arith.muli %c2_i32_62, %1 : i32
    %149 = arith.index_cast %148 : i32 to index
    %150 = memref.load %arg5[%149] : memref<8xf32, #tpu.memory_space<smem>>
    %151 = vector.broadcast %150 : f32 to vector<16x16xf32>
    %152 = arith.addf %140, %151 : vector<16x16xf32>
    %c2_i32_63 = arith.constant 2 : i32
    %153 = arith.muli %c2_i32_63, %1 : i32
    %c1_i32_64 = arith.constant 1 : i32
    %154 = arith.addi %153, %c1_i32_64 : i32
    %155 = arith.index_cast %154 : i32 to index
    %156 = memref.load %arg5[%155] : memref<8xf32, #tpu.memory_space<smem>>
    %157 = vector.broadcast %156 : f32 to vector<16x16xf32>
    %158 = arith.addf %147, %157 : vector<16x16xf32>
    %159 = vector.shape_cast %152 : vector<16x16xf32> to vector<1x16x16xf32>
    %160 = vector.shape_cast %158 : vector<16x16xf32> to vector<1x16x16xf32>
    %161 = tpu.concatenate %159, %160 in 0 : vector<1x16x16xf32>, vector<1x16x16xf32> -> vector<2x16x16xf32>
    %162 = vector.shape_cast %161 : vector<2x16x16xf32> to vector<1x2x16x16xf32>
    %c0_65 = arith.constant 0 : index
    %c0_66 = arith.constant 0 : index
    %c0_67 = arith.constant 0 : index
    %c0_68 = arith.constant 0 : index
    %163 = vector.load %arg6[%c0_65, %c0_66, %c0_67, %c0_68] : memref<1x2x16x16xf32, #tpu.memory_space<vmem>>, vector<1x2x16x16xf32>
    tpu.vector_store %arg6[%c0_65, %c0_66, %c0_67, %c0_68], %162 {strides = array<i32>} : memref<1x2x16x16xf32, #tpu.memory_space<vmem>>, vector<1x2x16x16xf32>,
    return
  }
  func.func @transform_0(%arg0: i32, %arg1: i32) -> (i32, i32, i32, i32) {
    %c0_i32 = arith.constant 0 : i32
    %c0_i32_0 = arith.constant 0 : i32
    %c0_i32_1 = arith.constant 0 : i32
    return %arg0, %arg1, %c0_i32, %c0_i32_0 : i32, i32, i32, i32
  }
  func.func @transform_1(%arg0: i32, %arg1: i32) -> i32 {
    %c0_i32 = arith.constant 0 : i32
    %c0_i32_0 = arith.constant 0 : i32
    return %c0_i32 : i32
  }
  func.func @transform_2(%arg0: i32, %arg1: i32) -> i32 {
    %c0_i32 = arith.constant 0 : i32
    %c0_i32_0 = arith.constant 0 : i32
    return %c0_i32 : i32
  }
  func.func @transform_3(%arg0: i32, %arg1: i32) -> i32 {
    %c0_i32 = arith.constant 0 : i32
    %c0_i32_0 = arith.constant 0 : i32
    return %c0_i32 : i32
  }
  func.func @transform_4(%arg0: i32, %arg1: i32) -> (i32, i32, i32, i32) {
    %c0_i32 = arith.constant 0 : i32
    %c0_i32_0 = arith.constant 0 : i32
    %c0_i32_1 = arith.constant 0 : i32
    return %arg0, %arg1, %c0_i32, %c0_i32_0 : i32, i32, i32, i32
  }
}

</mosaic_0001>

<bundles_post_ra>
// kernel: my_conv_forward.1
= control target key start
LH: loop header
LB: loop body
LE: loop exit
PB: predicated region body
PF: predicated region fallthrough
CT: control target
= control target key end

     0   :  { %s1244_s0 = inlined_call_operand.vmem [shape: f32[2,4,18,18], index: 0, kind: input, shape index: {}]   ;;  %s1245_s1 = inlined_call_operand.vmem [shape: f32[36], index: 1, kind: input, shape index: {}]   ;;  %s1246_s2 = inlined_call_operand.vmem [shape: f32[36], index: 2, kind: input, shape index: {}]   ;;  %s1247_s3 = inlined_call_operand.vmem [shape: f32[8], index: 3, kind: input, shape index: {}]   ;;  %s1248_s4 = inlined_call_operand.hbm [shape: f32[2,8,16,16], index: 4, kind: output, shape index: {}]  }
   0x1   :  { %1255 = sst [smem:[#allocation12_spill]] %s1245_s1 }
   0x2   :  { %1256 = sst [smem:[#allocation13_spill]] %s1246_s2 }
   0x3   :  { %9 = vsyncpa [#allocation4], 0 }
   0x4   :  { %10 = vsyncpa [#allocation6], 0 }
   0x5   :  { %11 = vsyncpa [#allocation3], 0 }
   0x6   :  { %13 = vsyncpa [#allocation3 + $0x1], 0  ;;  %s941_s15 = smov 0   ;;  %s943_s16 = smov 0  }
   0x7   :  { %s945_s17 = smov 0   ;;  %s947_s18 = smov 0  }
   0x8   :  { %s949_s19 = smov 0   ;;  %s951_s20 = smov 0  }
   0x9   :  { %s953_s21 = smov 0   ;;  %s955_s22 = smov 0  }
   0xa LB: > { %s631_s23 = sadd.s32 4294967295, %s906_s22   ;;  %s632_s24 = sadd.s32 4294967294, %s906_s22   ;;  %s906_s22 = sphi %s955_s22, %s19_s22   ;;  %s902_s21 = sphi %s953_s21, %s1275_s21   ;;  %s898_s20 = sphi %s951_s20, %s1274_s20   ;;  %s894_s19 = sphi %s949_s19, %s1273_s19   ;;  %s890_s18 = sphi %s947_s18, %s1272_s18   ;;  %s886_s17 = sphi %s945_s17, %s1271_s17   ;;  %s882_s16 = sphi %s943_s16, %s1270_s16   ;;  %s878_s15 = sphi %s941_s15, %s1269_s15  }
   0xb   : > { %s28_s25 = sadd.s32 1, %s898_s20  ;;  %s31_s26 = sadd.s32 1, %s902_s21 }
   0xc   : > { %p29_p0 = scmp.ge.s32.totalorder %s28_s25, 4  ;;  %s131_s27 = sadd.s32 1, %s886_s17 }
   0xd   : > { %p141_p1 = scmp.ne.s32.totalorder %s886_s17, %s882_s16  ;;  %p142_p2 = scmp.eq.s32.totalorder %s631_s23, 7 }
   0xe   : > { %s1277_s25 = smov (%p29_p0, %s28_s25), 0  ;;  %s1279_s26 = smov (!%p29_p0, %s31_s26), %s902_s21 }
   0xf   : > { %s127_s28 = ssub.s32 %s898_s20, %s1277_s25  ;;  %p993_p3 = por %p142_p2, %p141_p1 }
  0x10   : > { %p33_p4 = scmp.ge.s32.totalorder %s1279_s26, 2  ;;  %p147_p5 = scmp.ne.s32.totalorder %s882_s16, %s878_s15 }
  0x11   : > { %s1257_s29 = scalar_select %p993_p3, 1, 0 }
  0x12   : > { %p148_p6 = scmp.eq.s32.totalorder %s632_s24, 7  ;;  %p633_p7 = scmp.ge.s32.totalorder %s906_s22, 1 }
  0x13   : > { %s1281_s26 = smov (%p33_p4, %s1279_s26), 0  ;;  %p155_p9 = scmp.lt.s32.totalorder %s906_s22, 9 }
  0x14   : > { %p1002_p8 = por %p148_p6, %p147_p5  ;;  %s126_s5 = ssub.s32 %s902_s21, %s1281_s26 }
  0x15   : > { %s128_s6 = sor.u32 %s127_s28, %s126_s5  ;;  %p1009_p10 = pnand %p633_p7, %p155_p9 }
  0x16   : > { %s1258_s30 = scalar_select %p1002_p8, 1, 0 }
  0x17   : > { %s1259_s7 = scalar_select %p1009_p10, 1, 0 }
  0x18   : > { %p129_p11 = scmp.eq.s32.totalorder %s128_s6, 0  ;;  %p1013_p12 = scmp.eq.s32.totalorder %s631_s23, 0 }
  0x19   : > { %p669_p13 = pneg %p1009_p10  ;;  %s1261_s2 = sld [smem:[#allocation13_spill]] }
  0x1a   : > { %s1260_s8 = scalar_select %p1013_p12, 1, 0 }
  0x1b   : > { %s1023_s12 = scalar_select %p129_p11, %s886_s17, %s131_s27  }
  0x1c   : > { %p1027_p0 = pnand %p1013_p12, %p669_p13 }
  0x1e   : > { %p763_p2 = pneg %p1027_p0 }
  0x1f   : > { %s179_s11 = sshll.u32 %s1261_s2, 4  ;;  %s180_s11 = int_to_ptr.vmem [resolvable:$true] %s179_s11 }
  0x20   : > { %s761_s14 = scalar_lea.vmem %s180_s11, 16  ;;  %p769_p6 = scmp.lt.s32.totalorder %s180_s11, %s180_s11 }
  0x21   : > { %p762_p1 = scmp.ne.s32.totalorder %s180_s11, %s761_s14  ;;  %p770_p7 = scmp.lt.s32.totalorder %s761_s14, %s761_s14 }
  0x23   : > { %p764_p4 = pnand %p763_p2, %p762_p1  ;;  %p771_p9 = por %p770_p7, %p769_p6 }
  0x25   : > { %p765_p5 = pneg %p764_p4 }
  0x27   : > { %p772_p11 = pnand %p771_p9, %p765_p5 }
  0x29   : > { %775 = shalt.err (!%p772_p11)
}
  0x2a   : > { %s908_s23 = smov [#allocation5]   ;;  %s1263_s1 = sld [smem:[#allocation12_spill]] }
  0x2b   : > { %675 = dma.vmem_to_smem (!%p1027_p0), %s180_s11, 16, %s908_s23, [#allocation6]  }
  0x2c   : > { %s190_s9 = sshll.u32 %s1247_s3, 4  ;;  %s191_s9 = int_to_ptr.vmem [resolvable:$true] %s190_s9 }
  0x30   : > { %s168_s28 = sshll.u32 %s1263_s1, 4  ;;  %s169_s28 = int_to_ptr.vmem [resolvable:$true] %s168_s28 }
  0x31   : > { %s776_s10 = scalar_lea.vmem %s169_s28, 16  ;;  %p784_p5 = scmp.lt.s32.totalorder %s169_s28, %s169_s28 }
  0x32   : > { %p777_p13 = scmp.ne.s32.totalorder %s169_s28, %s776_s10  ;;  %p785_p6 = scmp.lt.s32.totalorder %s776_s10, %s776_s10 }
  0x34   : > { %p779_p1 = pnand %p777_p13, %p763_p2  ;;  %p786_p7 = por %p785_p6, %p784_p5 }
  0x36   : > { %p780_p4 = pneg %p779_p1 }
  0x38   : > { %p787_p9 = pnand %p786_p7, %p780_p4 }
  0x3a   : > { %790 = shalt.err (!%p787_p9)
}
  0x3b   : > { %s909_s11 = smov [#allocation2]   ;;  %s791_s14 = scalar_lea.vmem %s191_s9, 16 }
  0x3c   : > { %672 = dma.vmem_to_smem (!%p1027_p0), %s169_s28, 16, %s909_s11, [#allocation4]  }
  0x3d   : > { %p792_p11 = scmp.ne.s32.totalorder %s191_s9, %s791_s14  ;;  %p799_p12 = scmp.lt.s32.totalorder %s191_s9, %s191_s9 }
  0x3e   : > { %p800_p13 = scmp.lt.s32.totalorder %s791_s14, %s791_s14 }
  0x3f   : > { %p794_p8 = pnand %p792_p11, %p763_p2 }
  0x40   : > { %p801_p1 = por %p800_p13, %p799_p12 }
  0x41   : > { %p795_p3 = pneg %p794_p8 }
  0x43   : > { %p802_p10 = pnand %p801_p1, %p795_p3 }
  0x45   : > { %805 = shalt.err (!%p802_p10)
}
  0x46   : > { %s910_s23 = smov [#allocation7]   ;;  %p1264_p4 = scmp.ne.s32.totalorder %s1259_s7, 0 }
  0x47   : > { %678 = dma.vmem_to_smem (!%p1027_p0), %s191_s9, 16, %s910_s23, [#allocation6]  }
  0x48   : > { %215 = sbr.rel (%p1264_p4) target bundleno = 274 (0x112), region = 36  ;;  %p1265_p5 = scmp.ne.s32.totalorder (!%p1264_p4), %s1260_s8, 0 }
  0x4d   : > { %865 = dma.done.wait (%p1265_p5), [#allocation4], 16  }
  0x4e   : > { %867 = vsyncadd (%p1265_p5), [#allocation4], 4294967280 }
  0x4f   : > { %869 = dma.done.wait (%p1265_p5), [#allocation6], 32  }
  0x50   : > { %871 = vsyncadd (%p1265_p5), [#allocation6], 4294967264 }
  0x51   : > { %229 = sfence }
  0x52   : > { %p254_p3 = scmp.lt.s32.totalorder %s894_s19, 1  ;;  %p256_p8 = scmp.lt.s32.totalorder %s890_s18, 3  ;;  %vm493_vm0 = vcmask 130048  }
  0x53   : > { %s1067_s7 = smul.u32 9, %s890_s18  ;;  %s1253_s1 = smov 127  }
  0x54   : > { %s255_s13 = scalar_select %p254_p3, %s894_s19, 1 }
  0x55   : > { %s257_s24 = scalar_select %p256_p8, %s890_s18, 3 }
  0x56   : > { %s654_s27 = smul.u32 12, %s255_s13  ;;  %s279_s28 = sadd.s32 1, %s1067_s7 }
  0x57   : > { %s653_s5 = smul.u32 3, %s257_s24  ;;  %s294_s8 = sld [smem:[#allocation5 + %s279_s28]] }
  0x58   : > { %s280_s6 = sld [smem:[#allocation2 + %s279_s28]]  ;;  %s308_s9 = sadd.s32 2, %s1067_s7 }
  0x59   : > { %s260_s10 = sadd.s32 %s654_s27, %s653_s5  ;;  %s309_s11 = sld [smem:[#allocation2 + %s308_s9]] }
  0x5a   : > { %s643_s14 = sshll.u32 %s260_s10, 3  ;;  %s1080_s13 = sld [smem:[#allocation5 + %s308_s9]] }
  0x5b   : > { %s1076_s2 = scalar_lea.vmem %s1244_s0, %s643_s14  ;;  %s352_s24 = sadd.s32 4, %s1067_s7 }
  0x5c   : > { %v264_v0 = vld [vmem:[%s1076_s2] sm:$0xff]  ;;  %v265_v1 = vld [vmem:[%s1076_s2 + $0x8] sm:$0xff]  ;;  %s1084_s27 = sld [smem:[#allocation2 + %s352_s24]]  ;;  %s381_s28 = sadd.s32 5, %s1067_s7 }
  0x5d   : > { %v295_v2 = vstv %s294_s8  ;;  %s1088_s5 = sld [smem:[#allocation5 + %s352_s24]]  ;;  %s912_s23 = smov 126   ;;  %v338_v13 = vld [vmem:[%s1076_s2 + $0x9] sm:$0xff]  ;;  %v337_v16 = vld [vmem:[%s1076_s2 + $0x1] sm:$0xff] }
  0x5e   : > { %v296_v3 = vmul.f32 %v295_v2, %v264_v0  ;;  %v281_v4 = vstv %s280_s6  ;;  %v297_v6 = vmul.f32 %v295_v2, %v265_v1  ;;  %s1093_s8 = sld [smem:[#allocation2 + %s381_s28]]  ;;  %s339_s6 = sadd.s32 3, %s1067_s7  ;;  %v411_v30 = vld [vmem:[%s1076_s2 + $0xa] sm:$0xff]  ;;  %v410_v31 = vld [vmem:[%s1076_s2 + $0x2] sm:$0xff] }
  0x5f   : > { %v282_v5 = vmul.f32 %v281_v4, %v264_v0  ;;  %v283_v7 = vmul.f32 %v281_v4, %v265_v1  ;;  %v310_v8 = vstv %s309_s11  ;;  %s273_s9 = sld [smem:[#allocation5 + %s1067_s7]]  ;;  %s412_s11 = sadd.s32 6, %s1067_s7 }
  0x60   : > { %300 = vrot.lane.b32.xlu1 %v296_v3, %s1253_s1  ;;  %v312_v9 = vmul.f32 %v310_v8, %v265_v1  ;;  %v311_v10 = vmul.f32 %v310_v8, %v264_v0  ;;  %v324_v11 = vstv %s1080_s13  ;;  %s267_s10 = sld [smem:[#allocation2 + %s1067_s7]]  ;;  %p1267_p12 = scmp.ne.s32.totalorder %s1257_s29, 0 }
  0x61   : > { %286 = vrot.lane.b32.xlu0 %v282_v5, %s1253_s1  ;;  %s340_s14 = sld [smem:[#allocation2 + %s339_s6]]  ;;  %v326_v12 = vmul.f32 %v324_v11, %v265_v1  ;;  %v325_v15 = vmul.f32 %v324_v11, %v264_v0 }
  0x62   : > { %v354_v14 = vstv %s1084_s27  ;;  %s346_s24 = sld [smem:[#allocation5 + %s339_s6]]  ;;  %s425_s6 = sadd.s32 7, %s1067_s7 }
  0x63   : > { %s1106_s13 = sld [smem:[#allocation5 + %s412_s11]]  ;;  %v356_v17 = vmul.f32 %v354_v14, %v338_v13  ;;  %v355_v19 = vmul.f32 %v354_v14, %v337_v16  ;;  %v368_v23 = vstv %s1088_s5  ;;  %s454_s5 = sadd.s32 8, %s1067_s7 }
  0x64   : > { %302 = vrot.lane.b32.xlu1 %v297_v6, %s1253_s1  ;;  %s1117_s27 = sld [smem:[#allocation5 + %s381_s28]]  ;;  %s1266_s28 = smov 127   ;;  %v370_v35 = vmul.f32 %v368_v23, %v338_v13  ;;  %v369_v39 = vmul.f32 %v368_v23, %v337_v16  ;;  %v383_v40 = vstv %s1093_s8 }
  0x65   : > { %288 = vrot.lane.b32.xlu0 %v283_v7, %s1253_s1  ;;  %s413_s1 = sld [smem:[#allocation2 + %s412_s11]]  ;;  %v274_v18 = vstv %s273_s9  ;;  %v385_v43 = vmul.f32 %v383_v40, %v338_v13  ;;  %v384_v44 = vmul.f32 %v383_v40, %v337_v16  ;;  %s644_s7 = sshll.u32 %s890_s18, 1 }
  0x66   : > { %v1109_v20 = vmul.f32 %v274_v18, %v264_v0  ;;  %v268_v21 = vstv %s267_s10  ;;  %v1111_v22 = vmul.f32 %v274_v18, %v265_v1  ;;  %s426_s2 = sld [smem:[#allocation2 + %s425_s6]]  ;;  %s488_s11 = sadd.s32 1, %s644_s7 }
  0x67   : > { %v1119_v24 = vmul.f32 %v268_v21, %v264_v0  ;;  %v270_v25 = vmul.f32 %v268_v21, %v265_v1  ;;  %v341_v26 = vstv %s340_s14  ;;  %s455_s8 = sld [smem:[#allocation2 + %s454_s5]]  ;;  %s251_s14 = sand.u32 1, %s882_s16  }
  0x68   : > { %317 = vrot.lane.b32.xlu1 %v312_v9, %s912_s23  ;;  %v1122_v27 = vmul.f32 %v341_v26, %v338_v13  ;;  %v1124_v28 = vmul.f32 %v341_v26, %v337_v16  ;;  %v347_v29 = vstv %s346_s24  ;;  %s469_s9 = sld [smem:[#allocation5 + %s454_s5]]  ;;  %s652_s24 = sshll.u32 %s890_s18, 2 }
  0x69   : > { %315 = vrot.lane.b32.xlu0 %v311_v10, %s912_s23  ;;  %v1128_v32 = vmul.f32 %v347_v29, %v338_v13  ;;  %v1130_v33 = vmul.f32 %v347_v29, %v337_v16  ;;  %v420_v38 = vstv %s1106_s13  ;;  %s484_s10 = sld [smem:[#allocation7 + %s644_s7]]  ;;  %s648_s13 = sshll.u32 %s894_s19, 4 }
  0x6a   : > { %v1140_v41 = vmul.f32 %v420_v38, %v411_v30  ;;  %v1142_v42 = vmul.f32 %v420_v38, %v410_v31  ;;  %v397_v45 = vstv %s1117_s27  ;;  %s642_s27 = sshll.u32 %s251_s14, 5  ;;  %s913_s7 = smov [#allocation8]  }
  0x6b   : > { %v414_v34 = vstv %s413_s1  ;;  %s440_s1 = sld [smem:[#allocation5 + %s425_s6]]  ;;  %v399_v46 = vmul.f32 %v397_v45, %v338_v13  ;;  %v398_v47 = vmul.f32 %v397_v45, %v337_v16  ;;  %s512_s6 = sadd.s32 %s652_s24, %s648_s13 }
  0x6c   : > { %331 = vrot.lane.b32.xlu1 %v326_v12, %s912_s23  ;;  %v1133_v36 = vmul.f32 %v414_v34, %v411_v30  ;;  %v1135_v37 = vmul.f32 %v414_v34, %v410_v31  ;;  %v427_v48 = vstv %s426_s2  ;;  %s649_s18 = sshll.u32 %s512_s6, 7 }
  0x6d   : > { %329 = vrot.lane.b32.xlu0 %v325_v15, %s912_s23  ;;  %v429_v49 = vmul.f32 %v427_v48, %v411_v30  ;;  %v428_v50 = vmul.f32 %v427_v48, %v410_v31  ;;  %v456_v54 = vstv %s455_s8  ;;  %s1185_s5 = scalar_lea.hbm %s1248_s4, %s649_s18  ;;  %s1193_s8 = scalar_lea.sflag [#allocation3], %s251_s14 }
  0x6e   : > { %v458_v55 = vmul.f32 %v456_v54, %v411_v30  ;;  %v457_v56 = vmul.f32 %v456_v54, %v410_v31  ;;  %v470_v57 = vstv %s469_s9 }
  0x6f   : > { %v472_v58 = vmul.f32 %v470_v57, %v411_v30  ;;  %v471_v59 = vmul.f32 %v470_v57, %v410_v31 }
  0x70   : > { %361 = vrot.lane.b32.xlu1 %v356_v17, %s1266_s28 }
  0x71   : > { %359 = vrot.lane.b32.xlu0 %v355_v19, %s1266_s28  ;;  %v441_v51 = vstv %s440_s1 }
  0x72   : > { %v443_v52 = vmul.f32 %v441_v51, %v411_v30  ;;  %v442_v53 = vmul.f32 %v441_v51, %v410_v31 }
  0x74   : > { %375 = vrot.lane.b32.xlu1 %v370_v35, %s1266_s28 }
  0x75   : > { %373 = vrot.lane.b32.xlu0 %v369_v39, %s1266_s28 }
  0x78   : > { %390 = vrot.lane.b32.xlu1 %v385_v43, %s912_s23 }
  0x79   : > { %388 = vrot.lane.b32.xlu0 %v384_v44, %s912_s23  ;;  %v485_v44 = vstv %s484_s10  ;;  %s810_s10 = sshll.u32 %s913_s7, 4  ;;  %s811_s10 = int_to_ptr.vmem [resolvable:$false] %s810_s10 }
  0x7c   : > { %404 = vrot.lane.b32.xlu1 %v399_v46, %s912_s23 }
  0x7d   : > { %402 = vrot.lane.b32.xlu0 %v398_v47, %s912_s23 }
  0x80   : > { %434 = vrot.lane.b32.xlu1 %v429_v49, %s1266_s28 }
  0x81   : > { %432 = vrot.lane.b32.xlu0 %v428_v50, %s1266_s28 }
  0x84   : > { %448 = vrot.lane.b32.xlu1 %v443_v52, %s1266_s28 }
  0x85   : > { %446 = vrot.lane.b32.xlu0 %v442_v53, %s1266_s28  ;;  %s253_s28 = scalar_lea.vmem [#allocation8], %s642_s27 }
  0x86   : > { %s515_s2 = sshll.u32 %s253_s28, 4  ;;  %s1187_s2 = int_to_ptr.vmem [resolvable:$true] %s515_s2 }
  0x87   : > { %s806_s9 = scalar_lea.vmem %s1187_s2, 512  ;;  %p813_p6 = scmp.lt.s32.totalorder %s1187_s2, %s811_s10 }
  0x88   : > { %463 = vrot.lane.b32.xlu1 %v458_v55, %s912_s23  ;;  %p807_p10 = scmp.ne.s32.totalorder %s1187_s2, %s806_s9 }
  0x89   : > { %461 = vrot.lane.b32.xlu0 %v457_v56, %s912_s23 }
  0x8a   : > { %p808_p0 = pnand %p807_p10, %p1267_p12 }
  0x8c   : > { %477 = vrot.lane.b32.xlu1 %v472_v58, %s912_s23  ;;  %p809_p2 = pneg %p808_p0 }
  0x8d   : > { %475 = vrot.lane.b32.xlu0 %v471_v59, %s912_s23  ;;  %s1173_s23 = sld [smem:[#allocation7 + %s488_s11]]  ;;  %s812_s11 = scalar_lea.vmem %s811_s10, 1024 }
  0x8e   : > { %p814_p7 = scmp.lt.s32.totalorder %s812_s11, %s806_s9 }
  0x90   : > { %p815_p9 = por %p814_p7, %p813_p6 }
  0x92   : > { %p816_p11 = pnand %p815_p9, %p809_p2 }
  0x93   : > { %v490_v51 = vstv %s1173_s23 }
  0xd2   : > { %v301_v60 = vpop.permute.xlu1 %300 }
  0xd3   : > { %v287_v61 = vpop.permute.xlu0 %286  ;;  %v306_v8 = vadd.f32 %v301_v60, %v1109_v20 }
  0xd4   : > { %v292_v1 = vadd.f32 %v287_v61, %v1119_v24 }
  0xd6   : > { %v303_v62 = vpop.permute.xlu1 %302 }
  0xd7   : > { %v289_v63 = vpop.permute.xlu0 %288  ;;  %v307_v6 = vadd.f32 %v303_v62, %v1111_v22 }
  0xd8   : > { %v293_v0 = vadd.f32 %v289_v63, %v270_v25 }
  0xda   : > { %v318_v2 = vpop.permute.xlu1 %317 }
  0xdb   : > { %v322_v3 = vadd.f32 %v318_v2, %v293_v0  ;;  %v316_v4 = vpop.permute.xlu0 %315 }
  0xdc   : > { %v321_v5 = vadd.f32 %v316_v4, %v292_v1 }
  0xdd   : > { %v345_v7 = vadd.f32 %v1122_v27, %v322_v3 }
  0xde   : > { %v332_v9 = vpop.permute.xlu1 %331  ;;  %v344_v10 = vadd.f32 %v1124_v28, %v321_v5 }
  0xdf   : > { %v336_v11 = vadd.f32 %v332_v9, %v307_v6  ;;  %v330_v12 = vpop.permute.xlu0 %329 }
  0xe0   : > { %v335_v13 = vadd.f32 %v330_v12, %v306_v8 }
  0xe1   : > { %v351_v14 = vadd.f32 %v1128_v32, %v336_v11 }
  0xe2   : > { %v362_v15 = vpop.permute.xlu1 %361  ;;  %v350_v16 = vadd.f32 %v1130_v33, %v335_v13 }
  0xe3   : > { %v360_v17 = vpop.permute.xlu0 %359  ;;  %v366_v21 = vadd.f32 %v362_v15, %v345_v7 }
  0xe4   : > { %v365_v22 = vadd.f32 %v360_v17, %v344_v10 }
  0xe6   : > { %v376_v18 = vpop.permute.xlu1 %375 }
  0xe7   : > { %v374_v19 = vpop.permute.xlu0 %373  ;;  %v380_v26 = vadd.f32 %v376_v18, %v351_v14 }
  0xe8   : > { %v379_v28 = vadd.f32 %v374_v19, %v350_v16 }
  0xea   : > { %v391_v23 = vpop.permute.xlu1 %390 }
  0xeb   : > { %v395_v24 = vadd.f32 %v391_v23, %v366_v21  ;;  %v389_v20 = vpop.permute.xlu0 %388 }
  0xec   : > { %v394_v25 = vadd.f32 %v389_v20, %v365_v22 }
  0xed   : > { %v418_v27 = vadd.f32 %v1133_v36, %v395_v24 }
  0xee   : > { %v405_v29 = vpop.permute.xlu1 %404  ;;  %v417_v30 = vadd.f32 %v1135_v37, %v394_v25 }
  0xef   : > { %v409_v31 = vadd.f32 %v405_v29, %v380_v26  ;;  %v403_v32 = vpop.permute.xlu0 %402 }
  0xf0   : > { %v408_v33 = vadd.f32 %v403_v32, %v379_v28 }
  0xf1   : > { %v424_v34 = vadd.f32 %v1140_v41, %v409_v31 }
  0xf2   : > { %v435_v35 = vpop.permute.xlu1 %434  ;;  %v423_v38 = vadd.f32 %v1142_v42, %v408_v33 }
  0xf3   : > { %v433_v39 = vpop.permute.xlu0 %432  ;;  %v439_v37 = vadd.f32 %v435_v35, %v418_v27 }
  0xf4   : > { %v438_v43 = vadd.f32 %v433_v39, %v417_v30 }
  0xf6   : > { %v449_v36 = vpop.permute.xlu1 %448 }
  0xf7   : > { %v447_v40 = vpop.permute.xlu0 %446  ;;  %v453_v47 = vadd.f32 %v449_v36, %v424_v34 }
  0xf8   : > { %v452_v49 = vadd.f32 %v447_v40, %v423_v38 }
  0xfa   : > { %v464_v41 = vpop.permute.xlu1 %463 }
  0xfb   : > { %v468_v45 = vadd.f32 %v464_v41, %v439_v37  ;;  %v462_v46 = vpop.permute.xlu0 %461 }
  0xfc   : > { %v467_v42 = vadd.f32 %v462_v46, %v438_v43 }
  0xfd   : > { %v487_v48 = vadd.f32 %v485_v44, %v468_v45 }
  0xfe   : > { %v486_v50 = vadd.f32 %v485_v44, %v467_v42  ;;  %v478_v52 = vpop.permute.xlu1 %477 }
  0xff   : > { %495 = vst.msk [vmem:[%s253_s28 + $0x8] sm:$0xff] %vm493_vm0, %v487_v48  ;;  %v482_v53 = vadd.f32 %v478_v52, %v453_v47  ;;  %v476_v54 = vpop.permute.xlu0 %475 }
 0x100   : > { %494 = vst.msk [vmem:[%s253_s28] sm:$0xff] %vm493_vm0, %v486_v50  ;;  %v481_v55 = vadd.f32 %v476_v54, %v452_v49 }
 0x101   : > { %v492_v56 = vadd.f32 %v490_v51, %v482_v53 }
 0x102   : > { %v491_v57 = vadd.f32 %v490_v51, %v481_v55 }
 0x103   : > { %497 = vst.msk [vmem:[%s253_s28 + $0x18] sm:$0xff] %vm493_vm0, %v492_v56 }
 0x104   : > { %496 = vst.msk [vmem:[%s253_s28 + $0x10] sm:$0xff] %vm493_vm0, %v491_v57 }
 0x105   : > { %819 = shalt.err (!%p816_p11)
}
 0x106   : > { %s820_s14 = scalar_lea.hbm %s1185_s5, 512  ;;  %s824_s13 = scalar_lea.hbm %s1248_s4, 4096 }
 0x107   : > { %p821_p13 = scmp.ne.s32.totalorder %s1185_s5, %s820_s14  ;;  %p825_p5 = scmp.lt.s32.totalorder %s1185_s5, %s1248_s4 }
 0x108   : > { %p826_p3 = scmp.lt.s32.totalorder %s824_s13, %s820_s14 }
 0x109   : > { %p822_p1 = pnand %p821_p13, %p1267_p12 }
 0x10a   : > { %p827_p8 = por %p826_p3, %p825_p5 }
 0x10b   : > { %p823_p4 = pneg %p822_p1 }
 0x10d   : > { %p828_p10 = pnand %p827_p8, %p823_p4 }
 0x10f   : > { %831 = shalt.err (!%p828_p10)
}
 0x110   : > { %s914_s28 = smov 128   ;;  %s915_s18 = smov 8  }
 0x111   : > { %667 = dma.vmem_to_hbm [thread:$0]  (%p1267_p12), %s1187_s2, 512, %s1185_s5, %s1193_s8, %s914_s28, %s914_s28, %s915_s18  }
 0x112 PF: > { %p689_p0 = scmp.ge.s32.totalorder %s906_s22, 2  ;;  %s530_s19 = sand.u32 1, %s878_s15  }
 0x113   : > { %p1268_p2 = scmp.ne.s32.totalorder %s1258_s30, 0  ;;  %s531_s1 = scalar_lea.sflag [#allocation3], %s530_s19 }
 0x115   : > { %p680_p6 = pnand %p689_p0, %p1268_p2 }
 0x117   : > { %p681_p7 = pneg %p680_p6 }
 0x119   : > { %873 = dma.done.wait (%p681_p7), %s531_s1, 512  }
 0x11a   : > { %875 = vsyncadd (%p681_p7), %s531_s1, 4294966784  ;;  %s19_s22 = sadd.s32 1, %s906_s22   ;;  %s1269_s15 = smov %s882_s16 }
 0x11b   : > { %p16_p9 = scmp.ge.s32.totalorder %s19_s22, 10   ;;  %s1270_s16 = smov %s886_s17 }
 0x11c   : > { %s1271_s17 = smov %s1023_s12  ;;  %s1272_s18 = smov %s898_s20 }
 0x11d   : > { %s1273_s19 = smov %s902_s21  ;;  %s1274_s20 = smov %s1277_s25 }
 0x11e   : > { %s1275_s21 = smov %s1281_s26  ;;  %18 = sbr.rel (!%p16_p9) target bundleno = 10 (0xa), region = 84 }
 0x123   :  { %536 = vsyncpa [#allocation3], 1 }
 0x124   :  { %538 = vsyncpa [#allocation3 + $0x1], 1 }
 0x125   :  { %539 = vsyncpa [#allocation4], 1 }
 0x126   :  { %541 = vsyncpa [#allocation4 + $0x1], 1 }
 0x127   :  { %542 = vsyncpa [#allocation6], 1 }

</bundles_post_ra>
